<compile_context>
chip_gen: v5e
topology: v5e:2x2
jax: 0.10.0
libtpu: 0.0.40
codegen_flags: <defaults>
</compile_context>

<pallas_src>
import jax
import jax.numpy as jnp
from jax.experimental import pallas as pl
from jax.experimental.pallas import tpu as pltpu


def _round_up(n, m):
    return ((n + m - 1) // m) * m


def _fcff3l_kernel(x_ref, w1_ref, b1_ref, w2_ref, b2_ref, w3_ref, b3_ref, o_ref):
    # x_ref: (D_in, TM) -- batch on lanes.  All three layers ride the MXU;
    # bias + ReLU are VPU work hidden under MXU/DMA slack.  Accumulate in f32.
    x = x_ref[...]
    h = jnp.dot(w1_ref[...], x, preferred_element_type=jnp.float32)
    h = jnp.maximum(h + b1_ref[...], 0.0)
    h = jnp.dot(w2_ref[...], h.astype(w2_ref.dtype),
                preferred_element_type=jnp.float32)
    h = jnp.maximum(h + b2_ref[...], 0.0)
    out = jnp.dot(w3_ref[...], h.astype(w3_ref.dtype),
                  preferred_element_type=jnp.float32)
    o_ref[...] = (out + b3_ref[...]).astype(o_ref.dtype)


def prepare_params(params, compute_dtype=jnp.float32):
    """One-time prep (hoisted off the per-call path): cast weights to the
    streaming/compute dtype (bf16 recommended on v6e/v7x) and reshape biases
    to (out, 1) columns.  Weights keep PyTorch (out, in) layout."""
    return dict(
        w1=params["w1"].astype(compute_dtype),
        b1=params["b1"].reshape(-1, 1).astype(jnp.float32),
        w2=params["w2"].astype(compute_dtype),
        b2=params["b2"].reshape(-1, 1).astype(jnp.float32),
        w3=params["w3"].astype(compute_dtype),
        b3=params["b3"].reshape(1, 1).astype(jnp.float32),
    )


def fcff_3l_forward_tb(x_t, prepared, *, tm=8192, out_dtype=jnp.float32):
    """Core entry: x_t is (D_in, B) with batch on the lane axis. Returns (1, B)."""
    d_in, batch = x_t.shape
    h1 = prepared["w1"].shape[0]
    h2 = prepared["w2"].shape[0]

    # Large batch tile to amortize the ~0.35us/step grid overhead; clamp for
    # tiny batches.  Per-tile VMEM at tm=8192 (f32): 2 x 512 KiB x-tile
    # buffers + ~4 MiB of (32, tm) activations -> far under every chip's VMEM.
    tm_eff = min(tm, _round_up(batch, 128))
    b_pad = _round_up(batch, tm_eff)
    if b_pad != batch:
        x_t = jnp.pad(x_t, ((0, 0), (0, b_pad - batch)))

    const = lambda i: (0, 0)  # weights/biases: resident, never re-DMA'd
    grid = (b_pad // tm_eff,)

    out = pl.pallas_call(
        _fcff3l_kernel,
        out_shape=jax.ShapeDtypeStruct((1, b_pad), out_dtype),
        grid_spec=pltpu.PrefetchScalarGridSpec(
            num_scalar_prefetch=0,
            grid=grid,
            in_specs=[
                pl.BlockSpec((d_in, tm_eff), lambda i: (0, i)),  # streamed X tile
                pl.BlockSpec((h1, d_in), const),
                pl.BlockSpec((h1, 1), const),
                pl.BlockSpec((h2, h1), const),
                pl.BlockSpec((h2, 1), const),
                pl.BlockSpec((1, h2), const),
                pl.BlockSpec((1, 1), const),
            ],
            out_specs=pl.BlockSpec((1, tm_eff), lambda i: (0, i)),  # lane-dense
        ),
        compiler_params=pltpu.CompilerParams(
            dimension_semantics=("parallel",),  # shard batch across TCs on v7x
        ),
    )(x_t, prepared["w1"], prepared["b1"], prepared["w2"],
      prepared["b2"], prepared["w3"], prepared["b3"])
    return out[:, :batch]


def fcff_3l_forward(x, prepared, *, tm=8192):
    """Convenience entry matching PyTorch's (B, D_in) convention.
    Prefer fcff_3l_forward_tb with x already stored as (D_in, B) in a serving
    loop -- the transpose here is an extra HBM pass over x."""
    x_t = jnp.transpose(x).astype(prepared["w1"].dtype)
    out = fcff_3l_forward_tb(x_t, prepared, tm=tm, out_dtype=jnp.float32)
    return jnp.transpose(out)  # (B, 1)


def init_params(key, arch):
    """Deterministic init matching nn.Linear shapes: W (out, in), b (out,)."""
    k = jax.random.split(key, 6)
    d0, d1, d2 = arch

    def lin(kw, kb, fan_in, fan_out):
        bound = 1.0 / jnp.sqrt(fan_in)
        w = jax.random.uniform(kw, (fan_out, fan_in), jnp.float32, -bound, bound)
        b = jax.random.uniform(kb, (fan_out,), jnp.float32, -bound, bound)
        return w, b

    w1, b1 = lin(k[0], k[1], d0, d1)
    w2, b2 = lin(k[2], k[3], d1, d2)
    w3, b3 = lin(k[4], k[5], d2, 1)
    return dict(w1=w1, b1=b1, w2=w2, b2=b2, w3=w3, b3=b3)


if __name__ == "__main__":
    key = jax.random.PRNGKey(0)
    kx, kp = jax.random.split(key)

    arch = (16, 32, 32)   # arch[0]=in, arch[1]=hidden1, arch[2]=hidden2 ; out=1
    batch = 8

    x = jax.random.normal(kx, (batch, arch[0]), jnp.float32)
    params = init_params(kp, arch)

    def ref_forward(xx, p):
        a = jnp.maximum(xx @ p["w1"].T + p["b1"], 0.0)
        a = jnp.maximum(a @ p["w2"].T + p["b2"], 0.0)
        return a @ p["w3"].T + p["b3"]

    ref = ref_forward(x, params)

    # --- f32 path (exact check) ---------------------------------------------
    prep_f32 = prepare_params(params, jnp.float32)
    y = jax.block_until_ready(fcff_3l_forward(x, prep_f32))
    assert y.shape == (batch, 1)
    assert jnp.allclose(y, ref, atol=1e-5, rtol=1e-5)

    # --- multi-tile grid path (padding + >1 grid step) ----------------------
    batch2 = 300
    x2 = jax.random.normal(jax.random.PRNGKey(1), (batch2, arch[0]), jnp.float32)
    y2 = jax.block_until_ready(fcff_3l_forward(x2, prep_f32, tm=128))
    assert y2.shape == (batch2, 1)
    assert jnp.allclose(y2, ref_forward(x2, params), atol=1e-5, rtol=1e-5)

    # --- bf16 streaming path (mem-bound optimization for v6e/v7x) -----------
    prep_bf16 = prepare_params(params, jnp.bfloat16)
    y3 = jax.block_until_ready(fcff_3l_forward(x, prep_bf16))
    assert y3.shape == (batch, 1)
    assert jnp.allclose(y3, ref, atol=5e-2, rtol=5e-2)

    print("KERNEL_OK")
</pallas_src>

<mosaic_0001>
module attributes {stable_mosaic.version = 11 : i64} {
  func.func @_fcff3l_kernel(%arg0: i32, %arg1: memref<16x128xf32, #tpu.memory_space<vmem>>, %arg2: memref<32x16xf32, #tpu.memory_space<vmem>>, %arg3: memref<32x1xf32, #tpu.memory_space<vmem>>, %arg4: memref<32x32xf32, #tpu.memory_space<vmem>>, %arg5: memref<32x1xf32, #tpu.memory_space<vmem>>, %arg6: memref<1x32xf32, #tpu.memory_space<vmem>>, %arg7: memref<1x1xf32, #tpu.memory_space<vmem>>, %arg8: memref<1x128xf32, #tpu.memory_space<vmem>>) attributes {dimension_semantics = [#tpu.dimension_semantics<parallel>], iteration_bounds = array<i64: 1>, scalar_prefetch = 0 : i64, scratch_operands = 0 : i64, tpu.core_type = #tpu.core_type<tc>, window_params = [{transform_indices = @transform_0, window_bounds = array<i64: 16, 128>}, {pipeline_mode = #tpu.pipeline_mode<synchronous>, transform_indices = @transform_1, window_bounds = array<i64: 32, 16>}, {pipeline_mode = #tpu.pipeline_mode<synchronous>, transform_indices = @transform_2, window_bounds = array<i64: 32, 1>}, {pipeline_mode = #tpu.pipeline_mode<synchronous>, transform_indices = @transform_3, window_bounds = array<i64: 32, 32>}, {pipeline_mode = #tpu.pipeline_mode<synchronous>, transform_indices = @transform_4, window_bounds = array<i64: 32, 1>}, {pipeline_mode = #tpu.pipeline_mode<synchronous>, transform_indices = @transform_5, window_bounds = array<i64: 1, 32>}, {pipeline_mode = #tpu.pipeline_mode<synchronous>, transform_indices = @transform_6, window_bounds = array<i64: 1, 1>}, {transform_indices = @transform_7, window_bounds = array<i64: 1, 128>}]} {
    %c0 = arith.constant 0 : index
    %c0_0 = arith.constant 0 : index
    %0 = vector.load %arg1[%c0, %c0_0] : memref<16x128xf32, #tpu.memory_space<vmem>>, vector<16x128xf32>
    %c0_1 = arith.constant 0 : index
    %c0_2 = arith.constant 0 : index
    %1 = vector.load %arg2[%c0_1, %c0_2] : memref<32x16xf32, #tpu.memory_space<vmem>>, vector<32x16xf32>
    %cst = arith.constant dense<0.000000e+00> : vector<32x128xf32>
    %2 = tpu.matmul %1, %0, %cst {dimension_numbers = #tpu.dot_dimension_numbers<[1], [0], [0], [1], [0, 0, 1, 1], [], []>} : vector<32x16xf32>, vector<16x128xf32>, vector<32x128xf32> -> vector<32x128xf32>
    %c0_3 = arith.constant 0 : index
    %c0_4 = arith.constant 0 : index
    %3 = vector.load %arg3[%c0_3, %c0_4] : memref<32x1xf32, #tpu.memory_space<vmem>>, vector<32x1xf32>
    %4 = vector.broadcast %3 : vector<32x1xf32> to vector<32x128xf32>
    %5 = arith.addf %2, %4 : vector<32x128xf32>
    %cst_5 = arith.constant 0.000000e+00 : f32
    %6 = vector.broadcast %cst_5 : f32 to vector<32x128xf32>
    %7 = arith.maximumf %5, %6 : vector<32x128xf32>
    %c0_6 = arith.constant 0 : index
    %c0_7 = arith.constant 0 : index
    %8 = vector.load %arg4[%c0_6, %c0_7] : memref<32x32xf32, #tpu.memory_space<vmem>>, vector<32x32xf32>
    %cst_8 = arith.constant dense<0.000000e+00> : vector<32x128xf32>
    %9 = tpu.matmul %8, %7, %cst_8 {dimension_numbers = #tpu.dot_dimension_numbers<[1], [0], [0], [1], [0, 0, 1, 1], [], []>} : vector<32x32xf32>, vector<32x128xf32>, vector<32x128xf32> -> vector<32x128xf32>
    %c0_9 = arith.constant 0 : index
    %c0_10 = arith.constant 0 : index
    %10 = vector.load %arg5[%c0_9, %c0_10] : memref<32x1xf32, #tpu.memory_space<vmem>>, vector<32x1xf32>
    %11 = vector.broadcast %10 : vector<32x1xf32> to vector<32x128xf32>
    %12 = arith.addf %9, %11 : vector<32x128xf32>
    %cst_11 = arith.constant 0.000000e+00 : f32
    %13 = vector.broadcast %cst_11 : f32 to vector<32x128xf32>
    %14 = arith.maximumf %12, %13 : vector<32x128xf32>
    %c0_12 = arith.constant 0 : index
    %c0_13 = arith.constant 0 : index
    %15 = vector.load %arg6[%c0_12, %c0_13] : memref<1x32xf32, #tpu.memory_space<vmem>>, vector<1x32xf32>
    %cst_14 = arith.constant dense<0.000000e+00> : vector<1x128xf32>
    %16 = tpu.matmul %15, %14, %cst_14 {dimension_numbers = #tpu.dot_dimension_numbers<[1], [0], [0], [1], [0, 0, 1, 1], [], []>} : vector<1x32xf32>, vector<32x128xf32>, vector<1x128xf32> -> vector<1x128xf32>
    %c0_15 = arith.constant 0 : index
    %c0_16 = arith.constant 0 : index
    %17 = vector.load %arg7[%c0_15, %c0_16] : memref<1x1xf32, #tpu.memory_space<vmem>>, vector<1x1xf32>
    %18 = vector.broadcast %17 : vector<1x1xf32> to vector<1x128xf32>
    %19 = arith.addf %16, %18 : vector<1x128xf32>
    %c0_17 = arith.constant 0 : index
    %c0_18 = arith.constant 0 : index
    %20 = vector.load %arg8[%c0_17, %c0_18] : memref<1x128xf32, #tpu.memory_space<vmem>>, vector<1x128xf32>
    tpu.vector_store %arg8[%c0_17, %c0_18], %19 {strides = array<i32>} : memref<1x128xf32, #tpu.memory_space<vmem>>, vector<1x128xf32>,
    return
  }
  func.func @transform_0(%arg0: i32) -> (i32, i32) {
    %c0_i32 = arith.constant 0 : i32
    %c0_i32_0 = arith.constant 0 : i32
    return %c0_i32, %arg0 : i32, i32
  }
  func.func @transform_1(%arg0: i32) -> (i32, i32) {
    %c0_i32 = arith.constant 0 : i32
    %c0_i32_0 = arith.constant 0 : i32
    %c0_i32_1 = arith.constant 0 : i32
    return %c0_i32, %c0_i32_0 : i32, i32
  }
  func.func @transform_2(%arg0: i32) -> (i32, i32) {
    %c0_i32 = arith.constant 0 : i32
    %c0_i32_0 = arith.constant 0 : i32
    %c0_i32_1 = arith.constant 0 : i32
    return %c0_i32, %c0_i32_0 : i32, i32
  }
  func.func @transform_3(%arg0: i32) -> (i32, i32) {
    %c0_i32 = arith.constant 0 : i32
    %c0_i32_0 = arith.constant 0 : i32
    %c0_i32_1 = arith.constant 0 : i32
    return %c0_i32, %c0_i32_0 : i32, i32
  }
  func.func @transform_4(%arg0: i32) -> (i32, i32) {
    %c0_i32 = arith.constant 0 : i32
    %c0_i32_0 = arith.constant 0 : i32
    %c0_i32_1 = arith.constant 0 : i32
    return %c0_i32, %c0_i32_0 : i32, i32
  }
  func.func @transform_5(%arg0: i32) -> (i32, i32) {
    %c0_i32 = arith.constant 0 : i32
    %c0_i32_0 = arith.constant 0 : i32
    %c0_i32_1 = arith.constant 0 : i32
    return %c0_i32, %c0_i32_0 : i32, i32
  }
  func.func @transform_6(%arg0: i32) -> (i32, i32) {
    %c0_i32 = arith.constant 0 : i32
    %c0_i32_0 = arith.constant 0 : i32
    %c0_i32_1 = arith.constant 0 : i32
    return %c0_i32, %c0_i32_0 : i32, i32
  }
  func.func @transform_7(%arg0: i32) -> (i32, i32) {
    %c0_i32 = arith.constant 0 : i32
    %c0_i32_0 = arith.constant 0 : i32
    return %c0_i32, %arg0 : i32, i32
  }
}

</mosaic_0001>

<bundles_post_ra>
// kernel: tpu_custom_call.1
= control target key start
LH: loop header
LB: loop body
LE: loop exit
PB: predicated region body
PF: predicated region fallthrough
CT: control target
= control target key end

     0   :  { %s391_s0 = inlined_call_operand.vmem [shape: f32[16,128], index: 0, kind: input, shape index: {}]   ;;  %s392_s1 = inlined_call_operand.vmem [shape: f32[32,16], index: 1, kind: input, shape index: {}]   ;;  %s393_s2 = inlined_call_operand.vmem [shape: f32[32,1], index: 2, kind: input, shape index: {}]   ;;  %s394_s3 = inlined_call_operand.vmem [shape: f32[32,32], index: 3, kind: input, shape index: {}]   ;;  %s395_s4 = inlined_call_operand.vmem [shape: f32[32,1], index: 4, kind: input, shape index: {}]   ;;  %s396_s5 = inlined_call_operand.vmem [shape: f32[1,32], index: 5, kind: input, shape index: {}]   ;;  %s397_s6 = inlined_call_operand.<no memory space> [shape: f32[1,1], index: 6, kind: input, shape index: {}]   ;;  %s398_s7 = inlined_call_operand.hbm [shape: f32[1,128], index: 7, kind: output, shape index: {}]  }
   0x1   :  { %v12_v0 = vstv %s397_s6 }
   0x2   :  { %13 = vst [vmem:[#allocation2] sm:$0x1] %v12_v0 }
   0x3   :  { %v30_v1 = vld [vmem:[%s391_s0 + $0x8] sm:$0xff]  ;;  %v29_v2 = vld [vmem:[%s391_s0] sm:$0xff]  ;;  %vm59_vm0 = vcmask 130048   ;;  %v277_v4 = vmov 0   ;;  %v38_v5 = vld [vmem:[%s393_s2 + $0x18] sm:$0xff] }
   0x4   :  { %86 = vmatpush.msra.mxu0 %v30_v1  ;;  %v31_v3 = vld [vmem:[%s392_s1] sm:$0xff]  ;;  %249 = vset.pattern.permute.xlu1 %v277_v4  ;;  %v36_v6 = vld [vmem:[%s393_s2 + $0x8] sm:$0xff]  ;;  %v34_v7 = vld [vmem:[%s392_s1 + $0x18] sm:$0xff] }
   0x5   :  { %248 = vset.pattern.permute.xlu0 %v277_v4  ;;  %46 = vperm.xlu1 %249, %v36_v6  }
   0x6   :  { %87 = vmatpush.msra.mxu0 %v29_v2  ;;  %56 = vperm.xlu0 %248, %v38_v5  }
   0x7   :  { %227 = vmatmul.msk.f32.vlgmr.msra.gmra.mxu0 %vm59_vm0, %v31_v3  ;;  %236 = vmatpush.msra.mxu1 %v30_v1 }
   0x8   :  { %14 = vsyncpa [#allocation4], 0  ;;  %250 = vset.pattern.permute.xlu2 %v277_v4  ;;  %v35_v8 = vld [vmem:[%s393_s2] sm:$0xff]  ;;  %v37_v9 = vld [vmem:[%s393_s2 + $0x10] sm:$0xff]  ;;  %vm133_vm1 = vcmask 261120   ;;  %s278_s11 = smov [#allocation3]  }
   0x9   :  { %237 = vmatpush.msra.mxu1 %v29_v2  ;;  %v32_v10 = vld [vmem:[%s392_s1 + $0x8] sm:$0xff]  ;;  %v109_v11 = vld [vmem:[%s395_s4] sm:$0xff]  ;;  %v33_v13 = vld [vmem:[%s392_s1 + $0x10] sm:$0xff]  ;;  %s216_s0 = sshll.u32 %s278_s11, 4  ;;  %s218_s14 = sshll.u32 %s398_s7, 4  ;;  %s217_s0 = int_to_ptr.vmem [resolvable:$true] %s216_s0  ;;  %s219_s14 = int_to_ptr.hbm [resolvable:$true] %s218_s14 }
   0xa   :  { %230 = vmatmul.msk.f32.vlgmr.msra.gmra.mxu1 %vm59_vm0, %v34_v7  ;;  %v110_v12 = vld [vmem:[%s395_s4 + $0x8] sm:$0xff]  ;;  %v112_v17 = vld [vmem:[%s395_s4 + $0x18] sm:$0xff]  ;;  %v111_v22 = vld [vmem:[%s395_s4 + $0x10] sm:$0xff] }
   0xb   :  { %130 = vperm.xlu2 %250, %v112_v17   ;;  %v180_v28 = vld [vmem:[#allocation2] sm:$0x1]  ;;  %v106_v34 = vld [vmem:[%s394_s3 + $0x8] sm:$0xff]  ;;  %v107_v35 = vld [vmem:[%s394_s3 + $0x10] sm:$0xff] }
   0xc   :  { %v105_v33 = vld [vmem:[%s394_s3] sm:$0xff]  ;;  %v108_v36 = vld [vmem:[%s394_s3 + $0x18] sm:$0xff] }
   0xd   :  { %41 = vperm.xlu1 %249, %v35_v8   ;;  %v179_v53 = vld [vmem:[%s396_s5] sm:$0x1] }
   0xe   :  { %51 = vperm.xlu0 %248, %v37_v9  }
   0xf   :  { %228 = vmatmul.msk.f32.gmra.mxu0 %vm59_vm0, %v32_v10 }
  0x13   :  { %125 = vperm.xlu2 %250, %v111_v22  }
  0x15   :  { %115 = vperm.xlu1 %249, %v109_v11  }
  0x16   :  { %120 = vperm.xlu0 %248, %v110_v12  }
  0x17   :  { %229 = vmatmul.msk.f32.gmra.mxu0 %vm59_vm0, %v33_v13 }
  0x1b   :  { %183 = vperm.xlu2 %250, %v180_v28  }
  0x65   :  { %v131_v37 = vpop.permute.xlu2 %130 }
  0x6d   :  { %v126_v39 = vpop.permute.xlu2 %125 }
  0x75   :  { %v184_v54 = vpop.permute.xlu2 %183 }
  0x76   :  { %v186_v55 = vperm.slane %v184_v54, 0 }
  0x77   :  { %v47_v19 = vpop.permute.xlu1 %46 }
  0x78   :  { %v57_v15 = vpop.permute.xlu0 %56 }
  0x7f   :  { %v42_v23 = vpop.permute.xlu1 %41 }
  0x80   :  { %v52_v24 = vpop.permute.xlu0 %51 }
  0x84   :  { %v89_v14 = vpop.f32.mrf.mxu0 }
  0x85   :  { %v90_v29 = vadd.f32 %v89_v14, %v42_v23 }
  0x87   :  { %v98_v16 = vpop.f32.mrf.mxu1  ;;  %v101_v32 = vmax.f32 %v90_v29, 0.0  ;;  %v116_v48 = vpop.permute.xlu1 %115 }
  0x88   :  { %v99_v18 = vadd.f32 %v98_v16, %v57_v15  ;;  %v121_v44 = vpop.permute.xlu0 %120 }
  0x8a   :  { %v104_v20 = vmax.f32 %v99_v18, 0.0 }
  0x8c   :  { %v92_v21 = vpop.f32.mrf.mxu0  ;;  %158 = vmatpush.msrb.mxu1 %v104_v20  ;;  %238 = vmatpush.msra.mxu2 %v104_v20 }
  0x8d   :  { %239 = vmatpush.msra.mxu3 %v104_v20  ;;  %v93_v26 = vadd.f32 %v92_v21, %v47_v19 }
  0x8f   :  { %v102_v31 = vmax.f32 %v93_v26, 0.0 }
  0x94   :  { %v95_v25 = vpop.f32.mrf.mxu0 }
  0x95   :  { %v96_v27 = vadd.f32 %v95_v25, %v52_v24 }
  0x97   :  { %v103_v30 = vmax.f32 %v96_v27, 0.0 }
  0x99   :  { %159 = vmatpush.msrb.mxu1 %v103_v30  ;;  %240 = vmatpush.msra.mxu2 %v103_v30 }
  0x9a   :  { %241 = vmatpush.msra.mxu3 %v103_v30 }
  0x9b   :  { %160 = vmatpush.msrb.mxu1 %v102_v31  ;;  %242 = vmatpush.msra.mxu2 %v102_v31 }
  0x9c   :  { %243 = vmatpush.msra.mxu3 %v102_v31 }
  0x9d   :  { %161 = vmatpush.msrb.mxu1 %v101_v32  ;;  %244 = vmatpush.msra.mxu2 %v101_v32 }
  0x9e   :  { %245 = vmatpush.msra.mxu3 %v101_v32  ;;  %231 = vmatmul.msk.f32.vlgmr.msrb.gmra.mxu1 %vm133_vm1, %v105_v33 }
  0x9f   :  { %232 = vmatmul.msk.f32.vlgmr.msra.gmra.mxu2 %vm133_vm1, %v106_v34  ;;  %233 = vmatmul.msk.f32.vlgmr.msra.gmra.mxu3 %vm133_vm1, %v107_v35 }
  0xa7   :  { %234 = vmatmul.msk.f32.gmra.mxu3 %vm133_vm1, %v108_v36 }
 0x11b   :  { %v163_v45 = vpop.f32.mrf.mxu1 }
 0x11c   :  { %v164_v49 = vadd.f32 %v163_v45, %v116_v48 }
 0x11e   :  { %v175_v52 = vmax.f32 %v164_v49, 0.0 }
 0x122   :  { %v169_v38 = vpop.f32.mrf.mxu3  ;;  %v166_v40 = vpop.f32.mrf.mxu2 }
 0x123   :  { %v170_v42 = vadd.f32 %v169_v38, %v126_v39  ;;  %v167_v46 = vadd.f32 %v166_v40, %v121_v44 }
 0x125   :  { %v177_v50 = vmax.f32 %v170_v42, 0.0  ;;  %v176_v51 = vmax.f32 %v167_v46, 0.0 }
 0x12a   :  { %v172_v41 = vpop.f32.mrf.mxu3 }
 0x12b   :  { %v173_v43 = vadd.f32 %v172_v41, %v131_v37 }
 0x12d   :  { %v178_v47 = vmax.f32 %v173_v43, 0.0 }
 0x12f   :  { %202 = vmatpush.msrb.mxu2 %v178_v47 }
 0x131   :  { %203 = vmatpush.msrb.mxu2 %v177_v50 }
 0x133   :  { %204 = vmatpush.msrb.mxu2 %v176_v51 }
 0x135   :  { %205 = vmatpush.msrb.mxu2 %v175_v52 }
 0x136   :  { %235 = vmatmul.msk.f32.vlgmr.msrb.gmra.mxu2 %vm133_vm1, %v179_v53 }
 0x1b9   :  { %v207_v56 = vpop.f32.mrf.mxu2 }
 0x1ba   :  { %v208_v57 = vadd.f32 %v207_v56, %v186_v55 }
 0x1bc   :  { %210 = vst [vmem:[#allocation3] sm:$0x1] %v208_v57 }
 0x1bd   :  { %221 = dma.vmem_to_hbm [thread:$0]  %s217_s0, 16, %s219_s14, [#allocation4]  }
 0x1be   :  { %275 = dma.done.wait [#allocation4], 16  }
 0x1bf   :  { %276 = vsyncadd [#allocation4], 4294967280 }
 0x1c0   :  { %226 = vsyncpa [#allocation4], 1 }

</bundles_post_ra>
